<compile_context>
chip_gen: v7x
topology: tpu7x:2x2x1
jax: 0.10.0
libtpu: 0.0.40
codegen_flags: <defaults>
</compile_context>

<pallas_src>
import functools

import jax
import jax.numpy as jnp
from jax.experimental import pallas as pl
from jax.experimental.pallas import tpu as pltpu

LANE = 512            # lane-dense tile width (large multiple of 128)
MAX_TILE_ROWS = 1024  # (1024, 512) f32 block = 2 MiB


def _round_up(x: int, m: int) -> int:
    return ((x + m - 1) // m) * m


def _mean_kernel(x_ref, mean_ref, acc_ref, *, inv_n):
    """Pass 1: global sum into a resident f32 accumulator; finalize the mean."""
    i = pl.program_id(0)

    @pl.when(i == 0)
    def _():
        acc_ref[...] = jnp.zeros_like(acc_ref)

    # Per-tile partial sum, accumulated in f32 (input stays in native dtype).
    acc_ref[...] += jnp.sum(x_ref[...].astype(jnp.float32), keepdims=True)

    @pl.when(i == pl.num_programs(0) - 1)
    def _():
        # 1/n is a compile-time constant -> multiply, never divide.
        mean_ref[...] = acc_ref[...] * inv_n


def _subtract_kernel(mean_ref, x_ref, o_ref):
    """Pass 2: x - mean. mean is a scalar read from SMEM; cast on the store."""
    mean = mean_ref[0, 0]
    o_ref[...] = (x_ref[...].astype(jnp.float32) - mean).astype(o_ref.dtype)


def centered_layer(f_x: jax.Array) -> jax.Array:
    """Pallas equivalent of CenteredLayer.forward: f_x - f_x.mean()."""
    orig_shape = f_x.shape
    orig_dtype = f_x.dtype
    n = f_x.size

    # Flatten to a lane-dense (rows, LANE) slab in the *native* dtype.
    rows = (n + LANE - 1) // LANE
    tile_rows = min(MAX_TILE_ROWS, _round_up(rows, 8))
    padded_rows = _round_up(rows, tile_rows)
    padded_n = padded_rows * LANE

    flat = f_x.reshape(-1)
    if padded_n != n:
        # Zero padding contributes 0 to the sum; we divide by the true n.
        flat = jnp.pad(flat, (0, padded_n - n))
    x2d = flat.reshape(padded_rows, LANE)

    num_tiles = padded_rows // tile_rows

    # ---- Pass 1: global mean (resident accumulator, "arbitrary" axis). ----
    mean = pl.pallas_call(
        functools.partial(_mean_kernel, inv_n=1.0 / n),
        out_shape=jax.ShapeDtypeStruct((1, 1), jnp.float32),
        grid_spec=pltpu.PrefetchScalarGridSpec(
            num_scalar_prefetch=0,
            grid=(num_tiles,),
            in_specs=[pl.BlockSpec((tile_rows, LANE), lambda i: (i, 0))],
            out_specs=pl.BlockSpec((1, 1), lambda i: (0, 0)),
            scratch_shapes=[pltpu.VMEM((1, 1), jnp.float32)],
        ),
        compiler_params=pltpu.CompilerParams(
            dimension_semantics=("arbitrary",),
        ),
    )(x2d)

    # ---- Pass 2: tiled x - mean ("parallel" axis, mean as SMEM scalar). ----
    out2d = pl.pallas_call(
        _subtract_kernel,
        out_shape=jax.ShapeDtypeStruct((padded_rows, LANE), orig_dtype),
        grid_spec=pltpu.PrefetchScalarGridSpec(
            num_scalar_prefetch=0,
            grid=(num_tiles,),
            in_specs=[
                pl.BlockSpec(memory_space=pltpu.MemorySpace.SMEM),
                pl.BlockSpec((tile_rows, LANE), lambda i: (i, 0)),
            ],
            out_specs=pl.BlockSpec((tile_rows, LANE), lambda i: (i, 0)),
        ),
        compiler_params=pltpu.CompilerParams(
            dimension_semantics=("parallel",),
        ),
    )(mean, x2d)

    out_flat = out2d.reshape(-1)
    if padded_n != n:
        out_flat = out_flat[:n]
    return out_flat.reshape(orig_shape)


if __name__ == "__main__":
    key = jax.random.PRNGKey(0)
    # NCHW input, small shape: batch=2, channels=4, spatial=16x16.
    x = jax.random.normal(key, (2, 4, 16, 16), dtype=jnp.float32)

    y = centered_layer(x)
    y = jax.block_until_ready(y)

    # Reference check (pure JAX): semantics must match f_x - f_x.mean().
    ref = x - jnp.mean(x)
    assert y.shape == x.shape and y.dtype == x.dtype
    assert jnp.allclose(y, ref, atol=1e-5, rtol=1e-5)
    # Centered output should have ~zero mean.
    assert abs(float(jnp.mean(y))) < 1e-5

    print("KERNEL_OK")
</pallas_src>

<mosaic_0001>
module attributes {stable_mosaic.version = 11 : i64} {
  func.func @_mean_kernel(%arg0: i32, %arg1: memref<8x512xf32, #tpu.memory_space<vmem>>, %arg2: memref<1x1xf32, #tpu.memory_space<vmem>>, %arg3: memref<1x1xf32, #tpu.memory_space<vmem>>) attributes {dimension_semantics = [#tpu.dimension_semantics<arbitrary>], iteration_bounds = array<i64: 1>, scalar_prefetch = 0 : i64, scratch_operands = 1 : i64, tpu.core_type = #tpu.core_type<tc>, window_params = [{transform_indices = @transform_0, window_bounds = array<i64: 8, 512>}, {pipeline_mode = #tpu.pipeline_mode<synchronous>, transform_indices = @transform_1, window_bounds = array<i64: 1, 1>}]} {
    %c0_i32 = arith.constant 0 : i32
    %0 = arith.cmpi eq, %arg0, %c0_i32 : i32
    %1 = arith.extui %0 : i1 to i32
    %c0_i32_0 = arith.constant 0 : i32
    %2 = arith.cmpi ne, %1, %c0_i32_0 : i32
    scf.if %2 {
      %cst_8 = arith.constant 0.000000e+00 : f32
      %15 = vector.broadcast %cst_8 : f32 to vector<1x1xf32>
      %c0_9 = arith.constant 0 : index
      %c0_10 = arith.constant 0 : index
      %16 = vector.load %arg3[%c0_9, %c0_10] : memref<1x1xf32, #tpu.memory_space<vmem>>, vector<1x1xf32>
      tpu.vector_store %arg3[%c0_9, %c0_10], %15 {strides = array<i32>} : memref<1x1xf32, #tpu.memory_space<vmem>>, vector<1x1xf32>,
    } else {
    }
    %c0 = arith.constant 0 : index
    %c0_1 = arith.constant 0 : index
    %3 = vector.load %arg3[%c0, %c0_1] : memref<1x1xf32, #tpu.memory_space<vmem>>, vector<1x1xf32>
    %c0_2 = arith.constant 0 : index
    %c0_3 = arith.constant 0 : index
    %4 = vector.load %arg1[%c0_2, %c0_3] : memref<8x512xf32, #tpu.memory_space<vmem>>, vector<8x512xf32>
    %5 = vector.shape_cast %4 : vector<8x512xf32> to vector<1x8x512xf32>
    %cst = arith.constant dense<0.000000e+00> : vector<1xf32>
    %6 = vector.multi_reduction <add>, %5, %cst [1, 2] : vector<1x8x512xf32> to vector<1xf32>
    %7 = vector.shape_cast %6 : vector<1xf32> to vector<1x1x1xf32>
    %8 = vector.extract %7[0, 0, 0] : f32 from vector<1x1x1xf32>
    %9 = vector.broadcast %8 : f32 to vector<1x1xf32>
    %10 = arith.addf %3, %9 : vector<1x1xf32>
    %c0_4 = arith.constant 0 : index
    %c0_5 = arith.constant 0 : index
    %11 = vector.load %arg3[%c0_4, %c0_5] : memref<1x1xf32, #tpu.memory_space<vmem>>, vector<1x1xf32>
    tpu.vector_store %arg3[%c0_4, %c0_5], %10 {strides = array<i32>} : memref<1x1xf32, #tpu.memory_space<vmem>>, vector<1x1xf32>,
    %c0_i32_6 = arith.constant 0 : i32
    %12 = arith.cmpi eq, %arg0, %c0_i32_6 : i32
    %13 = arith.extui %12 : i1 to i32
    %c0_i32_7 = arith.constant 0 : i32
    %14 = arith.cmpi ne, %13, %c0_i32_7 : i32
    scf.if %14 {
      %c0_8 = arith.constant 0 : index
      %c0_9 = arith.constant 0 : index
      %15 = vector.load %arg3[%c0_8, %c0_9] : memref<1x1xf32, #tpu.memory_space<vmem>>, vector<1x1xf32>
      %cst_10 = arith.constant 4.8828125E-4 : f32
      %16 = vector.broadcast %cst_10 : f32 to vector<1x1xf32>
      %17 = arith.mulf %15, %16 : vector<1x1xf32>
      %c0_11 = arith.constant 0 : index
      %c0_12 = arith.constant 0 : index
      %18 = vector.load %arg2[%c0_11, %c0_12] : memref<1x1xf32, #tpu.memory_space<vmem>>, vector<1x1xf32>
      tpu.vector_store %arg2[%c0_11, %c0_12], %17 {strides = array<i32>} : memref<1x1xf32, #tpu.memory_space<vmem>>, vector<1x1xf32>,
    } else {
    }
    return
  }
  func.func @transform_0(%arg0: i32) -> (i32, i32) {
    %c0_i32 = arith.constant 0 : i32
    %c0_i32_0 = arith.constant 0 : i32
    return %arg0, %c0_i32 : i32, i32
  }
  func.func @transform_1(%arg0: i32) -> (i32, i32) {
    %c0_i32 = arith.constant 0 : i32
    %c0_i32_0 = arith.constant 0 : i32
    %c0_i32_1 = arith.constant 0 : i32
    return %c0_i32, %c0_i32_0 : i32, i32
  }
}

</mosaic_0001>

<bundles_post_ra>
// kernel: tpu_custom_call.1
= control target key start
LH: loop header
LB: loop body
LE: loop exit
PB: predicated region body
PF: predicated region fallthrough
CT: control target
= control target key end

     0   :  { %6 = vsyncpa [#allocation4], 0  ;;  %s162_s0 = inlined_call_operand.hbm [shape: f32[8,512], index: 0, kind: input, shape index: {}]   ;;  %s163_s1 = inlined_call_operand.hbm [shape: f32[1,1], index: 1, kind: output, shape index: {}]  }
   0x1   :  { %7 = vsyncpa [#allocation5], 0  ;;  %s122_s6 = smov [#allocation3]   ;;  %s74_s10 = scalar_lea.hbm %s162_s0, 512 }
   0x2   :  { %s14_s7 = sshll.u32 %s122_s6, 4  ;;  %p75_p0 = scmp.ne.s32.totalorder %s162_s0, %s74_s10  ;;  %s15_s7 = int_to_ptr.vmem [resolvable:$true] %s14_s7 }
   0x3   :  { %p78_p1 = scmp.lt.u32.totalorder %s74_s10, %s162_s0 }
   0x5   :  { %p80_p2 = pnand %p78_p1, %p75_p0 }
   0x7   :  { %83 = shalt.err (!%p80_p2)
}
   0x8   :  { %s84_s15 = scalar_lea.vmem %s15_s7, 512  ;;  %p89_p4 = scmp.lt.s32.totalorder %s15_s7, %s15_s7 }
   0x9   :  { %p85_p3 = scmp.ne.s32.totalorder %s15_s7, %s84_s15  ;;  %p90_p5 = scmp.lt.s32.totalorder %s84_s15, %s84_s15 }
   0xb   :  { %p91_p6 = por %p90_p5, %p89_p4 }
   0xd   :  { %p92_p7 = pnand %p91_p6, %p85_p3 }
   0xf   :  { %95 = shalt.err (!%p92_p7)
}
  0x10   :  { %17 = dma.hbm_to_vmem [thread:$0]  %s162_s0, 512, %s15_s7, [#allocation4]  }
  0x11   :  { %118 = dma.done.wait [#allocation4], 512  }
  0x12   :  { %119 = vsyncadd [#allocation4], 4294966784  ;;  %v28_v0 = vld [vmem:[#allocation3] sm:$0xff]  ;;  %v29_v1 = vld [vmem:[#allocation3 + $0x8] sm:$0xff]  ;;  %vm25_vm0 = vcmask 0   ;;  %v123_v7 = vmov 0.0  }
  0x13   :  { %v30_v2 = vld [vmem:[#allocation3 + $0x10] sm:$0xff]  ;;  %v32_v3 = vadd.f32 %v29_v1, %v28_v0  ;;  %v31_v4 = vld [vmem:[#allocation3 + $0x18] sm:$0xff]  ;;  %26 = vst.msk [vmem:[#allocation2] sm:$0x1] %vm25_vm0, %v123_v7  ;;  %s124_s18 = smov [#allocation6]  }
  0x14   :  { %s60_s19 = sshll.u32 %s124_s18, 4  ;;  %s61_s19 = int_to_ptr.vmem [resolvable:$true] %s60_s19 }
  0x15   :  { %v33_v5 = vadd.f32 %v32_v3, %v30_v2  ;;  %s96_s20 = scalar_lea.vmem %s61_s19, 16  ;;  %s100_s21 = scalar_lea.vmem %s61_s19, 32 }
  0x16   :  { %p97_p8 = scmp.ne.s32.totalorder %s61_s19, %s96_s20  ;;  %p101_p9 = scmp.lt.s32.totalorder %s61_s19, %s61_s19 }
  0x17   :  { %v34_v6 = vadd.f32 %v33_v5, %v31_v4  ;;  %p102_p10 = scmp.lt.s32.totalorder %s100_s21, %s96_s20 }
  0x19   :  { %35 = vadd.xlane.f32.xlu0 %v34_v6  ;;  %p103_p11 = por %p102_p10, %p101_p9 }
  0x1a   :  { %v27_v15 = vld [vmem:[#allocation2] sm:$0x1] }
  0x1b   :  { %p104_p12 = pnand %p103_p11, %p97_p8 }
  0xa6   :  { %v36_v8 = vpop.xlane.xlu0 %35 }
  0xa7   :  { %v37_v9 = vrot.slane %v36_v8, 4 }
  0xa9   :  { %v38_v10 = vadd.f32 %v37_v9, %v36_v8 }
  0xab   :  { %v39_v11 = vrot.slane %v38_v10, 2 }
  0xad   :  { %v40_v12 = vadd.f32 %v39_v11, %v38_v10 }
  0xaf   :  { %v41_v13 = vrot.slane %v40_v12, 1 }
  0xb1   :  { %v42_v14 = vadd.f32 %v41_v13, %v40_v12 }
  0xb3   :  { %69 = vpush %v42_v14 }
  0xe4   :  { %s70_s0 = spop %69 }
  0xe5   :  { %v44_v16 = vstv %s70_s0 }
  0xe6   :  { %v45_v17 = vadd.f32 %v44_v16, %v27_v15 }
  0xe8   :  { %47 = vst.msk [vmem:[#allocation2] sm:$0x1] %vm25_vm0, %v45_v17 }
  0xef   :  { %v51_v18 = vld [vmem:[#allocation2] sm:$0x1] }
  0xf0   :  { %v52_v19 = vmul.f32 0.00048828125, %v51_v18 }
  0xf2   :  { %53 = vst.msk [vmem:[#allocation6] sm:$0x1] %vm25_vm0, %v52_v19 }
  0xf3   :  { %107 = shalt.err (!%p104_p12)
}
  0xf4   :  { %s108_s24 = scalar_lea.hbm %s163_s1, 16 }
  0xf5   :  { %p109_p13 = scmp.ne.s32.totalorder %s163_s1, %s108_s24  ;;  %p112_p0 = scmp.lt.u32.totalorder %s108_s24, %s163_s1 }
  0xf7   :  { %p114_p1 = pnand %p112_p0, %p109_p13 }
  0xf9   :  { %117 = shalt.err (!%p114_p1)
}
  0xfa   :  { %63 = dma.vmem_to_hbm [thread:$0]  %s61_s19, 16, %s163_s1, [#allocation5]  }
  0xfb   :  { %120 = dma.done.wait [#allocation5], 16  }
  0xfc   :  { %121 = vsyncadd [#allocation5], 4294967280 }
  0xfd   :  { %67 = vsyncpa [#allocation4], 1 }
  0xfe   :  { %68 = vsyncpa [#allocation5], 1 }

</bundles_post_ra>
